<compile_context>
chip_gen: v6e
topology: v6e:2x2x1
jax: 0.10.0
libtpu: 0.0.40
codegen_flags: <defaults>
</compile_context>

<pallas_src>
import math

import numpy as np
import jax
import jax.numpy as jnp
from jax.experimental import pallas as pl
from jax.experimental.pallas import tpu as pltpu


def _round_up(x, m):
    return ((x + m - 1) // m) * m


# ------------------------------- Pallas kernel ------------------------------ #

def _fused_fft3_kernel(x_ref, ww_ref, ldh_ref, o_ref):
    """One (D,H,W) cube -> truncated 3-D spectrum, entirely in VMEM.

    x_ref:   (1, D*H, W)   real input cube, rows ordered (d, h)
    ww_ref:  (W, 2*Kw)     [Re(Ww) | Im(Ww)] ortho rfft weight
    ldh_ref: (2*P, D*H)    [Re(kron(Wd,Wh))^T ; 0pad ; Im(kron(Wd,Wh))^T ; 0pad]
    o_ref:   (1, P, 2*Kw)  [Re | Im] spectrum, rows = (kd, kh) padded to P
    """
    p = o_ref.shape[1]
    kw = o_ref.shape[2] // 2

    # Stage 1: rfft along W (one real matmul; output columns = [Yr | Yi]).
    y = jnp.dot(x_ref[0], ww_ref[...], preferred_element_type=jnp.float32)

    # Stage 2: fused D and H DFTs.  One MXU matmul with the stacked
    # real/imag kron(Wd, Wh)^T weight yields all four real products.
    t = jnp.dot(ldh_ref[...], y, preferred_element_type=jnp.float32)

    # Complex recombination:  Zr = Wr^T Yr - Wi^T Yi,  Zi = Wr^T Yi + Wi^T Yr.
    zr = t[:p, :kw] - t[p:, kw:]
    zi = t[:p, kw:] + t[p:, :kw]
    o_ref[0] = jnp.concatenate([zr, zi], axis=1)   # lane-dense [Re | Im]


# ------------------------------ Module wrapper ------------------------------ #

class DistributedRealFFT3:
    """JAX/Pallas port of modulus' DistributedRealFFT3 (comm sizes == 1)."""

    def __init__(self, nd, nh, nw, ldmax=None, lhmax=None, lwmax=None):
        # TODO(synk): distributed_transpose_w/h are multi-rank all-to-alls; with
        # comm_size_h == comm_size_w == 1 they are identities (exactly what the
        # reference module computes in that case), so they are omitted here.
        self.comm_size_h = 1
        self.comm_size_w = 1
        self.nd, self.nh, self.nw = nd, nh, nw
        self.ldmax = min(ldmax or nd, nd)
        self.lhmax = min(lhmax or nh, nh)
        self.lwmax = min(lwmax or nw // 2 + 1, nw // 2 + 1)
        self.ldmax_high = math.ceil(self.ldmax / 2)
        self.ldmax_low = math.floor(self.ldmax / 2)
        self.lhmax_high = math.ceil(self.lhmax / 2)
        self.lhmax_low = math.floor(self.lhmax / 2)
        lhdist = (self.lhmax + self.comm_size_h - 1) // self.comm_size_h
        self.lhpad = lhdist * self.comm_size_h - self.lhmax
        lwdist = (self.lwmax + self.comm_size_w - 1) // self.comm_size_w
        self.lwpad = lwdist * self.comm_size_w - self.lwmax

        # Deterministic "weights": ortho-normalized DFT matrices.
        def dft_cols(n, cols):
            k = np.arange(n)[:, None].astype(np.float64)
            l = np.asarray(cols, dtype=np.float64)[None, :]
            return np.exp(-2j * np.pi * k * l / n) / np.sqrt(n)

        # rfft along W: first lwmax frequencies.
        ww = dft_cols(nw, np.arange(self.lwmax))                       # (W, Kw)
        # fft along D / H with the low/high mode selection of the reference.
        d_cols = np.concatenate([np.arange(self.ldmax_high),
                                 np.arange(nd - self.ldmax_low, nd)])
        h_cols = np.concatenate([np.arange(self.lhmax_high),
                                 np.arange(nh - self.lhmax_low, nh)])
        wd = dft_cols(nd, d_cols)                                      # (D, Kd)
        wh = dft_cols(nh, h_cols)                                      # (H, Kh)

        # Lane-dense rfft weight: [Re | Im] along N.
        self.ww_c = jnp.asarray(
            np.concatenate([ww.real, ww.imag], axis=1), jnp.float32)   # (W, 2Kw)

        # Fused D+H weight kron(Wd, Wh): both remaining axes are transformed by
        # a single left matmul per cube (data rows are (d, h)).  Real and imag
        # parts are stacked along rows, each padded to a multiple of 8 so all
        # in-kernel row slices stay sublane-aligned.
        # TODO(synk): for production-scale nh/nw (cube or kron weight exceeding
        # VMEM) a 3-matmul separable variant with inter-stage tiling is needed.
        wdh = np.kron(wd, wh)                                          # (DH, KdKh)
        self.kdkh = self.ldmax * self.lhmax
        self.kdkh_pad = _round_up(self.kdkh, 8)
        ldh = np.zeros((2 * self.kdkh_pad, nd * nh), dtype=np.float64)
        ldh[:self.kdkh, :] = wdh.real.T
        ldh[self.kdkh_pad:self.kdkh_pad + self.kdkh, :] = wdh.imag.T
        self.ldh = jnp.asarray(ldh, jnp.float32)                       # (2P, DH)

    def __call__(self, x):
        assert x.ndim == 5
        assert x.shape[1] % self.comm_size_h == 0
        assert x.shape[1] % self.comm_size_w == 0
        B, C, D, H, W = x.shape
        assert D == self.nd and H == self.nh and W == self.nw
        Kw, Kd, Kh = self.lwmax, self.ldmax, self.lhmax
        P = self.kdkh_pad
        BC = B * C

        # Free, contiguous view: one (D*H, W) slab per (batch, channel) cube.
        x3 = x.reshape(BC, D * H, W).astype(jnp.float32)

        out3 = pl.pallas_call(
            _fused_fft3_kernel,
            out_shape=jax.ShapeDtypeStruct((BC, P, 2 * Kw), jnp.float32),
            grid_spec=pltpu.PrefetchScalarGridSpec(
                num_scalar_prefetch=0,
                grid=(BC,),
                in_specs=[
                    pl.BlockSpec((1, D * H, W), lambda i: (i, 0, 0)),
                    # Weights: whole-array, single-copy VMEM residents
                    # (no double-buffering, unlike a blocked constant-index spec).
                    pl.BlockSpec(memory_space=pltpu.MemorySpace.VMEM),
                    pl.BlockSpec(memory_space=pltpu.MemorySpace.VMEM),
                ],
                out_specs=pl.BlockSpec((1, P, 2 * Kw), lambda i: (i, 0, 0)),
            ),
            compiler_params=pltpu.CompilerParams(
                dimension_semantics=("parallel",)),
        )(x3, self.ww_c, self.ldh)

        # Cheap epilogue on the (small) truncated spectrum only.
        o = out3[:, :self.kdkh, :]
        out = (o[..., :Kw] + 1j * o[..., Kw:]).reshape(B, C, Kd, Kh, Kw)

        # Padding for the distributed transposes (zero when comm sizes == 1).
        if self.lwpad or self.lhpad:
            out = jnp.pad(out, ((0, 0), (0, 0), (0, 0),
                                (0, self.lhpad), (0, self.lwpad)))
        return out


# ----------------------------------- main ----------------------------------- #

if __name__ == "__main__":
    B, C, nd, nh, nw = 2, 4, 8, 8, 16
    ldmax, lhmax, lwmax = 6, 6, 8  # exercise the frequency-truncation paths

    key = jax.random.PRNGKey(0)
    x = jax.random.normal(key, (B, C, nd, nh, nw), dtype=jnp.float32)

    mod = DistributedRealFFT3(nd, nh, nw, ldmax=ldmax, lhmax=lhmax, lwmax=lwmax)
    fwd = jax.jit(mod.__call__)
    out = jax.block_until_ready(fwd(x))

    # Host-side numpy reference following the PyTorch module (comm sizes == 1).
    xn = np.asarray(x)
    xtf = np.fft.rfft2(xn, s=(nd, nw), axes=(2, 4), norm="ortho")
    xtft = xtf[..., :mod.lwmax]
    xtftt = np.concatenate(
        [xtft[:, :, :mod.ldmax_high, ...],
         xtft[:, :, xtft.shape[2] - mod.ldmax_low:, ...]], axis=2)
    ytt = xtftt[..., :nh, :]
    yo = np.fft.fft(ytt, n=nh, axis=3, norm="ortho")
    yot = np.concatenate(
        [yo[..., :mod.lhmax_high, :],
         yo[..., yo.shape[3] - mod.lhmax_low:, :]], axis=3)

    assert out.shape == yot.shape, (out.shape, yot.shape)
    np.testing.assert_allclose(np.asarray(out), yot.astype(np.complex64),
                               atol=2e-3, rtol=2e-3)
    print("KERNEL_OK")
</pallas_src>

<mosaic_0001>
module attributes {stable_mosaic.version = 11 : i64} {
  func.func @_fused_fft3_kernel(%arg0: i32, %arg1: memref<1x64x16xf32, #tpu.memory_space<vmem>>, %arg2: memref<16x16xf32, #tpu.memory_space<vmem>>, %arg3: memref<80x64xf32, #tpu.memory_space<vmem>>, %arg4: memref<1x40x16xf32, #tpu.memory_space<vmem>>) attributes {dimension_semantics = [#tpu.dimension_semantics<parallel>], iteration_bounds = array<i64: 8>, scalar_prefetch = 0 : i64, scratch_operands = 0 : i64, tpu.core_type = #tpu.core_type<tc>, window_params = [{transform_indices = @transform_0, window_bounds = array<i64: 1, 64, 16>}, {pipeline_mode = #tpu.pipeline_mode<synchronous>, transform_indices = @transform_1, window_bounds = array<i64: 16, 16>}, {pipeline_mode = #tpu.pipeline_mode<synchronous>, transform_indices = @transform_2, window_bounds = array<i64: 80, 64>}, {transform_indices = @transform_3, window_bounds = array<i64: 1, 40, 16>}]} {
    %c0 = arith.constant 0 : index
    %c0_0 = arith.constant 0 : index
    %c0_1 = arith.constant 0 : index
    %0 = vector.load %arg1[%c0, %c0_0, %c0_1] : memref<1x64x16xf32, #tpu.memory_space<vmem>>, vector<1x64x16xf32>
    %1 = vector.shape_cast %0 : vector<1x64x16xf32> to vector<64x16xf32>
    %c0_2 = arith.constant 0 : index
    %c0_3 = arith.constant 0 : index
    %2 = vector.load %arg2[%c0_2, %c0_3] : memref<16x16xf32, #tpu.memory_space<vmem>>, vector<16x16xf32>
    %cst = arith.constant dense<0.000000e+00> : vector<64x16xf32>
    %3 = tpu.matmul %1, %2, %cst {dimension_numbers = #tpu.dot_dimension_numbers<[1], [0], [0], [1], [0, 0, 1, 1], [], []>} : vector<64x16xf32>, vector<16x16xf32>, vector<64x16xf32> -> vector<64x16xf32>
    %c0_4 = arith.constant 0 : index
    %c0_5 = arith.constant 0 : index
    %4 = vector.load %arg3[%c0_4, %c0_5] : memref<80x64xf32, #tpu.memory_space<vmem>>, vector<80x64xf32>
    %cst_6 = arith.constant dense<0.000000e+00> : vector<80x16xf32>
    %5 = tpu.matmul %4, %3, %cst_6 {dimension_numbers = #tpu.dot_dimension_numbers<[1], [0], [0], [1], [0, 0, 1, 1], [], []>} : vector<80x64xf32>, vector<64x16xf32>, vector<80x16xf32> -> vector<80x16xf32>
    %6 = vector.extract_strided_slice %5 {offsets = [0, 0], sizes = [40, 8], strides = [1, 1]} : vector<80x16xf32> to vector<40x8xf32>
    %7 = vector.extract_strided_slice %5 {offsets = [40, 8], sizes = [40, 8], strides = [1, 1]} : vector<80x16xf32> to vector<40x8xf32>
    %8 = arith.subf %6, %7 : vector<40x8xf32>
    %9 = vector.extract_strided_slice %5 {offsets = [0, 8], sizes = [40, 8], strides = [1, 1]} : vector<80x16xf32> to vector<40x8xf32>
    %10 = vector.extract_strided_slice %5 {offsets = [40, 0], sizes = [40, 8], strides = [1, 1]} : vector<80x16xf32> to vector<40x8xf32>
    %11 = arith.addf %9, %10 : vector<40x8xf32>
    %12 = tpu.concatenate %8, %11 in 1 : vector<40x8xf32>, vector<40x8xf32> -> vector<40x16xf32>
    %c0_7 = arith.constant 0 : index
    %c0_8 = arith.constant 0 : index
    %c0_9 = arith.constant 0 : index
    %13 = vector.load %arg4[%c0_7, %c0_8, %c0_9] : memref<1x40x16xf32, #tpu.memory_space<vmem>>, vector<1x40x16xf32>
    %14 = vector.shape_cast %13 : vector<1x40x16xf32> to vector<40x16xf32>
    %15 = vector.shape_cast %12 : vector<40x16xf32> to vector<1x40x16xf32>
    tpu.vector_store %arg4[%c0_7, %c0_8, %c0_9], %15 {strides = array<i32>} : memref<1x40x16xf32, #tpu.memory_space<vmem>>, vector<1x40x16xf32>,
    return
  }
  func.func @transform_0(%arg0: i32) -> (i32, i32, i32) {
    %c0_i32 = arith.constant 0 : i32
    %c0_i32_0 = arith.constant 0 : i32
    %c0_i32_1 = arith.constant 0 : i32
    return %arg0, %c0_i32, %c0_i32_0 : i32, i32, i32
  }
  func.func @transform_1(%arg0: i32) -> (i32, i32) {
    %c0_i32 = arith.constant 0 : i32
    %c0_i32_0 = arith.constant 0 : i32
    %c0_i32_1 = arith.constant 0 : i32
    return %c0_i32, %c0_i32_0 : i32, i32
  }
  func.func @transform_2(%arg0: i32) -> (i32, i32) {
    %c0_i32 = arith.constant 0 : i32
    %c0_i32_0 = arith.constant 0 : i32
    %c0_i32_1 = arith.constant 0 : i32
    return %c0_i32, %c0_i32_0 : i32, i32
  }
  func.func @transform_3(%arg0: i32) -> (i32, i32, i32) {
    %c0_i32 = arith.constant 0 : i32
    %c0_i32_0 = arith.constant 0 : i32
    %c0_i32_1 = arith.constant 0 : i32
    return %arg0, %c0_i32, %c0_i32_0 : i32, i32, i32
  }
}

</mosaic_0001>

<bundles_post_ra>
// kernel: custom-call
= control target key start
LH: loop header
LB: loop body
LE: loop exit
PB: predicated region body
PF: predicated region fallthrough
CT: control target
= control target key end

     0   :  { %s912_s0 = inlined_call_operand.vmem [shape: f32[2,4,6,6,8], index: 0, kind: input, shape index: {}]   ;;  %s913_s2 = inlined_call_operand.vmem [shape: c64[2,4,6,6,8], index: 2, kind: output, shape index: {}]   ;;  %s914_s1 = inlined_call_operand.vmem [shape: f32[2,4,6,6,8], index: 1, kind: input, shape index: {}]  }
   0x1   :  { %v5_v0 = vld [vmem:[%s912_s0] sm:$0xff]  ;;  %v324_v1 = vld [vmem:[%s912_s0 + $0x8] sm:$0xff]  ;;  %v326_v2 = vld [vmem:[%s912_s0 + $0x10] sm:$0xff] }
   0x2   :  { %6 = vst [vmem:[%s913_s2] sm:$0xff] %v5_v0  ;;  %325 = vst [vmem:[%s913_s2 + $0x8] sm:$0xff] %v324_v1  ;;  %v328_v3 = vld [vmem:[%s912_s0 + $0x18] sm:$0xff]  ;;  %v330_v4 = vld [vmem:[%s912_s0 + $0x20] sm:$0xff] }
   0x3   :  { %327 = vst [vmem:[%s913_s2 + $0x10] sm:$0xff] %v326_v2  ;;  %v332_v5 = vld [vmem:[%s912_s0 + $0x28] sm:$0xff]  ;;  %329 = vst [vmem:[%s913_s2 + $0x18] sm:$0xff] %v328_v3  ;;  %v334_v6 = vld [vmem:[%s912_s0 + $0x30] sm:$0xff] }
   0x4   :  { %331 = vst [vmem:[%s913_s2 + $0x20] sm:$0xff] %v330_v4  ;;  %333 = vst [vmem:[%s913_s2 + $0x28] sm:$0xff] %v332_v5  ;;  %v336_v7 = vld [vmem:[%s912_s0 + $0x38] sm:$0xff]  ;;  %v338_v8 = vld [vmem:[%s912_s0 + $0x40] sm:$0xff] }
   0x5   :  { %335 = vst [vmem:[%s913_s2 + $0x30] sm:$0xff] %v334_v6  ;;  %337 = vst [vmem:[%s913_s2 + $0x38] sm:$0xff] %v336_v7  ;;  %v340_v9 = vld [vmem:[%s912_s0 + $0x48] sm:$0xff]  ;;  %v342_v10 = vld [vmem:[%s912_s0 + $0x50] sm:$0xff] }
   0x6   :  { %339 = vst [vmem:[%s913_s2 + $0x40] sm:$0xff] %v338_v8  ;;  %v344_v11 = vld [vmem:[%s912_s0 + $0x58] sm:$0xff]  ;;  %341 = vst [vmem:[%s913_s2 + $0x48] sm:$0xff] %v340_v9  ;;  %v346_v12 = vld [vmem:[%s912_s0 + $0x60] sm:$0xff] }
   0x7   :  { %343 = vst [vmem:[%s913_s2 + $0x50] sm:$0xff] %v342_v10  ;;  %345 = vst [vmem:[%s913_s2 + $0x58] sm:$0xff] %v344_v11  ;;  %v348_v13 = vld [vmem:[%s912_s0 + $0x68] sm:$0xff]  ;;  %v350_v14 = vld [vmem:[%s912_s0 + $0x70] sm:$0xff] }
   0x8   :  { %347 = vst [vmem:[%s913_s2 + $0x60] sm:$0xff] %v346_v12  ;;  %349 = vst [vmem:[%s913_s2 + $0x68] sm:$0xff] %v348_v13  ;;  %v352_v15 = vld [vmem:[%s912_s0 + $0x78] sm:$0xff]  ;;  %v354_v16 = vld [vmem:[%s912_s0 + $0x80] sm:$0xff] }
   0x9   :  { %351 = vst [vmem:[%s913_s2 + $0x70] sm:$0xff] %v350_v14  ;;  %v356_v17 = vld [vmem:[%s912_s0 + $0x88] sm:$0xff]  ;;  %353 = vst [vmem:[%s913_s2 + $0x78] sm:$0xff] %v352_v15  ;;  %v358_v18 = vld [vmem:[%s912_s0 + $0x90] sm:$0xff] }
   0xa   :  { %355 = vst [vmem:[%s913_s2 + $0x80] sm:$0xff] %v354_v16  ;;  %357 = vst [vmem:[%s913_s2 + $0x88] sm:$0xff] %v356_v17  ;;  %v360_v19 = vld [vmem:[%s912_s0 + $0x98] sm:$0xff]  ;;  %v362_v20 = vld [vmem:[%s912_s0 + $0xa0] sm:$0xff] }
   0xb   :  { %359 = vst [vmem:[%s913_s2 + $0x90] sm:$0xff] %v358_v18  ;;  %361 = vst [vmem:[%s913_s2 + $0x98] sm:$0xff] %v360_v19  ;;  %v364_v21 = vld [vmem:[%s912_s0 + $0xa8] sm:$0xff]  ;;  %v366_v22 = vld [vmem:[%s912_s0 + $0xb0] sm:$0xff] }
   0xc   :  { %363 = vst [vmem:[%s913_s2 + $0xa0] sm:$0xff] %v362_v20  ;;  %v368_v23 = vld [vmem:[%s912_s0 + $0xb8] sm:$0xff]  ;;  %365 = vst [vmem:[%s913_s2 + $0xa8] sm:$0xff] %v364_v21  ;;  %v370_v24 = vld [vmem:[%s912_s0 + $0xc0] sm:$0xff] }
   0xd   :  { %367 = vst [vmem:[%s913_s2 + $0xb0] sm:$0xff] %v366_v22  ;;  %369 = vst [vmem:[%s913_s2 + $0xb8] sm:$0xff] %v368_v23  ;;  %v372_v25 = vld [vmem:[%s912_s0 + $0xc8] sm:$0xff]  ;;  %v374_v26 = vld [vmem:[%s912_s0 + $0xd0] sm:$0xff] }
   0xe   :  { %371 = vst [vmem:[%s913_s2 + $0xc0] sm:$0xff] %v370_v24  ;;  %373 = vst [vmem:[%s913_s2 + $0xc8] sm:$0xff] %v372_v25  ;;  %v376_v27 = vld [vmem:[%s912_s0 + $0xd8] sm:$0xff]  ;;  %v378_v28 = vld [vmem:[%s912_s0 + $0xe0] sm:$0xff] }
   0xf   :  { %375 = vst [vmem:[%s913_s2 + $0xd0] sm:$0xff] %v374_v26  ;;  %v380_v29 = vld [vmem:[%s912_s0 + $0xe8] sm:$0xff]  ;;  %377 = vst [vmem:[%s913_s2 + $0xd8] sm:$0xff] %v376_v27  ;;  %v382_v30 = vld [vmem:[%s912_s0 + $0xf0] sm:$0xff] }
  0x10   :  { %379 = vst [vmem:[%s913_s2 + $0xe0] sm:$0xff] %v378_v28  ;;  %381 = vst [vmem:[%s913_s2 + $0xe8] sm:$0xff] %v380_v29  ;;  %v384_v31 = vld [vmem:[%s912_s0 + $0xf8] sm:$0xff]  ;;  %v386_v32 = vld [vmem:[%s912_s0 + $0x100] sm:$0xff] }
  0x11   :  { %383 = vst [vmem:[%s913_s2 + $0xf0] sm:$0xff] %v382_v30  ;;  %385 = vst [vmem:[%s913_s2 + $0xf8] sm:$0xff] %v384_v31  ;;  %v388_v33 = vld [vmem:[%s912_s0 + $0x108] sm:$0xff]  ;;  %v390_v34 = vld [vmem:[%s912_s0 + $0x110] sm:$0xff] }
  0x12   :  { %387 = vst [vmem:[%s913_s2 + $0x100] sm:$0xff] %v386_v32  ;;  %v392_v35 = vld [vmem:[%s912_s0 + $0x118] sm:$0xff]  ;;  %389 = vst [vmem:[%s913_s2 + $0x108] sm:$0xff] %v388_v33  ;;  %v147_v36 = vld [vmem:[%s914_s1] sm:$0xff] }
  0x13   :  { %391 = vst [vmem:[%s913_s2 + $0x110] sm:$0xff] %v390_v34  ;;  %393 = vst [vmem:[%s913_s2 + $0x118] sm:$0xff] %v392_v35  ;;  %v395_v37 = vld [vmem:[%s914_s1 + $0x8] sm:$0xff]  ;;  %v397_v38 = vld [vmem:[%s914_s1 + $0x10] sm:$0xff] }
  0x14   :  { %394 = vst [vmem:[%s913_s2 + $0x120] sm:$0xff] %v147_v36  ;;  %396 = vst [vmem:[%s913_s2 + $0x128] sm:$0xff] %v395_v37  ;;  %v399_v39 = vld [vmem:[%s914_s1 + $0x18] sm:$0xff]  ;;  %v401_v40 = vld [vmem:[%s914_s1 + $0x20] sm:$0xff] }
  0x15   :  { %398 = vst [vmem:[%s913_s2 + $0x130] sm:$0xff] %v397_v38  ;;  %v403_v41 = vld [vmem:[%s914_s1 + $0x28] sm:$0xff]  ;;  %400 = vst [vmem:[%s913_s2 + $0x138] sm:$0xff] %v399_v39  ;;  %v405_v42 = vld [vmem:[%s914_s1 + $0x30] sm:$0xff] }
  0x16   :  { %402 = vst [vmem:[%s913_s2 + $0x140] sm:$0xff] %v401_v40  ;;  %404 = vst [vmem:[%s913_s2 + $0x148] sm:$0xff] %v403_v41  ;;  %v407_v43 = vld [vmem:[%s914_s1 + $0x38] sm:$0xff]  ;;  %v409_v44 = vld [vmem:[%s914_s1 + $0x40] sm:$0xff] }
  0x17   :  { %406 = vst [vmem:[%s913_s2 + $0x150] sm:$0xff] %v405_v42  ;;  %408 = vst [vmem:[%s913_s2 + $0x158] sm:$0xff] %v407_v43  ;;  %v411_v45 = vld [vmem:[%s914_s1 + $0x48] sm:$0xff]  ;;  %v413_v46 = vld [vmem:[%s914_s1 + $0x50] sm:$0xff] }
  0x18   :  { %410 = vst [vmem:[%s913_s2 + $0x160] sm:$0xff] %v409_v44  ;;  %v415_v47 = vld [vmem:[%s914_s1 + $0x58] sm:$0xff]  ;;  %412 = vst [vmem:[%s913_s2 + $0x168] sm:$0xff] %v411_v45  ;;  %v417_v48 = vld [vmem:[%s914_s1 + $0x60] sm:$0xff] }
  0x19   :  { %414 = vst [vmem:[%s913_s2 + $0x170] sm:$0xff] %v413_v46  ;;  %416 = vst [vmem:[%s913_s2 + $0x178] sm:$0xff] %v415_v47  ;;  %v419_v49 = vld [vmem:[%s914_s1 + $0x68] sm:$0xff]  ;;  %v421_v50 = vld [vmem:[%s914_s1 + $0x70] sm:$0xff] }
  0x1a   :  { %418 = vst [vmem:[%s913_s2 + $0x180] sm:$0xff] %v417_v48  ;;  %420 = vst [vmem:[%s913_s2 + $0x188] sm:$0xff] %v419_v49  ;;  %v423_v51 = vld [vmem:[%s914_s1 + $0x78] sm:$0xff]  ;;  %v425_v52 = vld [vmem:[%s914_s1 + $0x80] sm:$0xff] }
  0x1b   :  { %422 = vst [vmem:[%s913_s2 + $0x190] sm:$0xff] %v421_v50  ;;  %v427_v53 = vld [vmem:[%s914_s1 + $0x88] sm:$0xff]  ;;  %424 = vst [vmem:[%s913_s2 + $0x198] sm:$0xff] %v423_v51  ;;  %v429_v54 = vld [vmem:[%s914_s1 + $0x90] sm:$0xff] }
  0x1c   :  { %426 = vst [vmem:[%s913_s2 + $0x1a0] sm:$0xff] %v425_v52  ;;  %428 = vst [vmem:[%s913_s2 + $0x1a8] sm:$0xff] %v427_v53  ;;  %v431_v55 = vld [vmem:[%s914_s1 + $0x98] sm:$0xff]  ;;  %v433_v56 = vld [vmem:[%s914_s1 + $0xa0] sm:$0xff] }
  0x1d   :  { %430 = vst [vmem:[%s913_s2 + $0x1b0] sm:$0xff] %v429_v54  ;;  %432 = vst [vmem:[%s913_s2 + $0x1b8] sm:$0xff] %v431_v55  ;;  %v435_v57 = vld [vmem:[%s914_s1 + $0xa8] sm:$0xff]  ;;  %v437_v58 = vld [vmem:[%s914_s1 + $0xb0] sm:$0xff] }
  0x1e   :  { %434 = vst [vmem:[%s913_s2 + $0x1c0] sm:$0xff] %v433_v56  ;;  %v439_v59 = vld [vmem:[%s914_s1 + $0xb8] sm:$0xff]  ;;  %436 = vst [vmem:[%s913_s2 + $0x1c8] sm:$0xff] %v435_v57  ;;  %v441_v60 = vld [vmem:[%s914_s1 + $0xc0] sm:$0xff] }
  0x1f   :  { %438 = vst [vmem:[%s913_s2 + $0x1d0] sm:$0xff] %v437_v58  ;;  %440 = vst [vmem:[%s913_s2 + $0x1d8] sm:$0xff] %v439_v59  ;;  %v443_v61 = vld [vmem:[%s914_s1 + $0xc8] sm:$0xff]  ;;  %v445_v62 = vld [vmem:[%s914_s1 + $0xd0] sm:$0xff] }
  0x20   :  { %442 = vst [vmem:[%s913_s2 + $0x1e0] sm:$0xff] %v441_v60  ;;  %444 = vst [vmem:[%s913_s2 + $0x1e8] sm:$0xff] %v443_v61  ;;  %v447_v63 = vld [vmem:[%s914_s1 + $0xd8] sm:$0xff]  ;;  %v449_v0 = vld [vmem:[%s914_s1 + $0xe0] sm:$0xff] }
  0x21   :  { %446 = vst [vmem:[%s913_s2 + $0x1f0] sm:$0xff] %v445_v62  ;;  %v451_v1 = vld [vmem:[%s914_s1 + $0xe8] sm:$0xff]  ;;  %448 = vst [vmem:[%s913_s2 + $0x1f8] sm:$0xff] %v447_v63  ;;  %v453_v2 = vld [vmem:[%s914_s1 + $0xf0] sm:$0xff] }
  0x22   :  { %450 = vst [vmem:[%s913_s2 + $0x200] sm:$0xff] %v449_v0  ;;  %452 = vst [vmem:[%s913_s2 + $0x208] sm:$0xff] %v451_v1  ;;  %v455_v3 = vld [vmem:[%s914_s1 + $0xf8] sm:$0xff]  ;;  %v457_v4 = vld [vmem:[%s914_s1 + $0x100] sm:$0xff] }
  0x23   :  { %454 = vst [vmem:[%s913_s2 + $0x210] sm:$0xff] %v453_v2  ;;  %456 = vst [vmem:[%s913_s2 + $0x218] sm:$0xff] %v455_v3  ;;  %v459_v5 = vld [vmem:[%s914_s1 + $0x108] sm:$0xff]  ;;  %v461_v6 = vld [vmem:[%s914_s1 + $0x110] sm:$0xff] }
  0x24   :  { %458 = vst [vmem:[%s913_s2 + $0x220] sm:$0xff] %v457_v4  ;;  %v463_v7 = vld [vmem:[%s914_s1 + $0x118] sm:$0xff]  ;;  %460 = vst [vmem:[%s913_s2 + $0x228] sm:$0xff] %v459_v5 }
  0x25   :  { %462 = vst [vmem:[%s913_s2 + $0x230] sm:$0xff] %v461_v6  ;;  %464 = vst [vmem:[%s913_s2 + $0x238] sm:$0xff] %v463_v7 }

// kernel: a_call__.1
= control target key start
LH: loop header
LB: loop body
LE: loop exit
PB: predicated region body
PF: predicated region fallthrough
CT: control target
= control target key end

     0   :  { %8 = vsyncpa [#allocation3], 0  ;;  %s1169_s0 = inlined_call_operand.hbm [shape: f32[8,64,16], index: 0, kind: input, shape index: {}]   ;;  %s1170_s1 = inlined_call_operand.hbm [shape: f32[16,16], index: 1, kind: input, shape index: {}]   ;;  %s1171_s2 = inlined_call_operand.hbm [shape: f32[80,64], index: 2, kind: input, shape index: {}]   ;;  %s1172_s3 = inlined_call_operand.vmem [shape: f32[8,40,16], index: 3, kind: output, shape index: {}]  }
   0x1   :  { %10 = vsyncpa [#allocation3 + $0x1], 0 }
   0x2   :  { %11 = vsyncpa [#allocation5], 0  ;;  %s995_s12 = smov 0   ;;  %s997_s13 = smov 0  }
   0x3   :  { %s999_s14 = smov 0   ;;  %s1001_s15 = smov 0  }
   0x4 LB: > { %s1014_s16 = sadd.s32 4294967295, %s966_s15   ;;  %p37_p0 = scmp.ne.s32.totalorder %s958_s13, %s954_s12  ;;  %s966_s15 = sphi %s1001_s15, %s1187_s15   ;;  %s962_s14 = sphi %s999_s14, %s1186_s14   ;;  %s958_s13 = sphi %s997_s13, %s1185_s13   ;;  %s954_s12 = sphi %s995_s12, %s1184_s12  }
   0x5   : > { %p1173_p1 = scmp.eq.s32.totalorder %s1014_s16, 0  ;;  %p659_p2 = scmp.ge.s32.totalorder %s966_s15, 1 }
   0x6   : > { %p116_p3 = scmp.lt.s32.totalorder %s966_s15, 9  ;;  %s968_s19 = smov [#allocation4]  }
   0x7   : > { %p1022_p4 = por %p1173_p1, %p37_p0  ;;  %s128_s20 = sshll.u32 %s968_s19, 4  ;;  %s129_s20 = int_to_ptr.vmem [resolvable:$true] %s128_s20 }
   0x8   : > { %p1026_p5 = pnand %p659_p2, %p116_p3  ;;  %s969_s22 = smov [#allocation6]  }
   0x9   : > { %s1176_s17 = scalar_select %p1022_p4, 1, 0 }
   0xa   : > { %s1177_s18 = scalar_select %p1026_p5, 1, 0 }
   0xb   : > { %p794_p6 = pneg %p1026_p5  ;;  %s141_s23 = sshll.u32 %s969_s22, 4  ;;  %s142_s23 = int_to_ptr.vmem [resolvable:$true] %s141_s23 }
   0xc   : > { %s859_s24 = scalar_lea.vmem %s129_s20, 256  ;;  %p867_p12 = scmp.lt.s32.totalorder %s129_s20, %s129_s20 }
   0xd   : > { %p1034_p7 = pnand %p794_p6, %p1173_p1  ;;  %p860_p9 = scmp.ne.s32.totalorder %s129_s20, %s859_s24 }
   0xe   : > { %p868_p13 = scmp.lt.s32.totalorder %s859_s24, %s859_s24 }
   0xf   : > { %p850_p8 = pneg %p1034_p7 }
  0x10   : > { %p869_p0 = por %p868_p13, %p867_p12 }
  0x11   : > { %p862_p10 = pnand %p860_p9, %p850_p8 }
  0x13   : > { %p863_p11 = pneg %p862_p10 }
  0x15   : > { %p870_p2 = pnand %p869_p0, %p863_p11 }
  0x17   : > { %873 = shalt.err (!%p870_p2)
}
  0x18   : > { %s970_s25 = smov 128   ;;  %s971_s26 = smov 8  }
  0x19   : > { %797 = dma.hbm_to_vmem [thread:$0]  (!%p1034_p7), %s1170_s1, 256, %s129_s20, [#allocation5], %s970_s25, %s970_s25, %s971_s26  }
  0x1a   : > { %s885_s29 = scalar_lea.vmem %s142_s23, 1280  ;;  %p893_p10 = scmp.lt.s32.totalorder %s142_s23, %s142_s23 }
  0x1b   : > { %p886_p3 = scmp.ne.s32.totalorder %s142_s23, %s885_s29  ;;  %p894_p11 = scmp.lt.s32.totalorder %s885_s29, %s885_s29 }
  0x1d   : > { %p888_p6 = pnand %p886_p3, %p850_p8  ;;  %p895_p12 = por %p894_p11, %p893_p10 }
  0x1f   : > { %p889_p9 = pneg %p888_p6 }
  0x21   : > { %p896_p13 = pnand %p895_p12, %p889_p9 }
  0x23   : > { %899 = shalt.err (!%p896_p13)
}
  0x24   : > { %800 = dma.hbm_to_vmem [thread:$0]  (!%p1034_p7), %s1171_s2, 1280, %s142_s23, [#allocation5], %s970_s25, %s970_s25, %s971_s26  }
  0x25   : > { %s1063_s5 = sadd.s32 1, %s966_s15   ;;  %s24_s6 = sadd.s32 1, %s962_s14 }
  0x26   : > { %s21_s7 = ssub.s32 %s966_s15, %s1063_s5  ;;  %p31_p8 = scmp.ne.s32.totalorder %s962_s14, %s958_s13 }
  0x27   : > { %p22_p0 = scmp.eq.s32.totalorder %s21_s7, 0  ;;  %p32_p2 = scmp.eq.s32.totalorder %s966_s15, 0 }
  0x28   : > { %p807_p3 = scmp.lt.s32.totalorder %s966_s15, 8  ;;  %s155_s8 = sand.u32 1, %s962_s14  }
  0x29   : > { %s1074_s9 = scalar_select %p22_p0, %s962_s14, %s24_s6  }
  0x2a   : > { %p33_p6 = por %p32_p2, %p31_p8  ;;  %s663_s10 = sshll.u32 %s155_s8, 6 }
  0x2b   : > { %s691_s11 = sshll.u32 %s966_s15, 10  ;;  %s159_s21 = scalar_lea.vmem [#allocation2], %s663_s10 }
  0x2c   : > { %s1080_s20 = scalar_lea.hbm %s1169_s0, %s691_s11  ;;  %s166_s22 = sshll.u32 %s159_s21, 4  ;;  %s1086_s22 = int_to_ptr.vmem [resolvable:$true] %s166_s22 }
  0x2d   : > { %p1082_p7 = pnand %p807_p3, %p33_p6  ;;  %s1088_s24 = scalar_lea.sflag [#allocation3], %s155_s8 }
  0x2e   : > { %s900_s15 = scalar_lea.hbm %s1080_s20, 1024  ;;  %s905_s29 = scalar_lea.hbm %s1169_s0, 8192 }
  0x2f   : > { %p901_p9 = scmp.ne.s32.totalorder %s1080_s20, %s900_s15  ;;  %p902_p10 = pneg %p1082_p7 }
  0x30   : > { %p906_p13 = scmp.lt.s32.totalorder %s1080_s20, %s1169_s0  ;;  %p907_p8 = scmp.lt.s32.totalorder %s905_s29, %s900_s15 }
  0x31   : > { %p903_p11 = pnand %p902_p10, %p901_p9 }
  0x32   : > { %p908_p0 = por %p907_p8, %p906_p13 }
  0x33   : > { %p904_p12 = pneg %p903_p11 }
  0x35   : > { %p909_p2 = pnand %p908_p0, %p904_p12 }
  0x37   : > { %912 = shalt.err (!%p909_p2)
}
  0x38   : > { %s913_s6 = scalar_lea.vmem %s1086_s22, 1024  ;;  %s972_s7 = smov [#allocation2]  }
  0x39   : > { %p914_p3 = scmp.ne.s32.totalorder %s1086_s22, %s913_s6  ;;  %s918_s8 = sshll.u32 %s972_s7, 4  ;;  %s919_s8 = int_to_ptr.vmem [resolvable:$false] %s918_s8 }
  0x3a   : > { %s920_s10 = scalar_lea.vmem %s919_s8, 2048  ;;  %p921_p11 = scmp.lt.s32.totalorder %s1086_s22, %s919_s8 }
  0x3b   : > { %p916_p6 = pnand %p914_p3, %p902_p10  ;;  %p922_p1 = scmp.lt.s32.totalorder %s920_s10, %s913_s6 }
  0x3d   : > { %p917_p9 = pneg %p916_p6  ;;  %p923_p4 = por %p922_p1, %p921_p11 }
  0x3f   : > { %p924_p5 = pnand %p923_p4, %p917_p9 }
  0x41   : > { %927 = shalt.err (!%p924_p5)
}
  0x42   : > { %804 = dma.hbm_to_vmem [thread:$0]  (!%p1082_p7), %s1080_s20, 1024, %s1086_s22, %s1088_s24, %s970_s25, %s970_s25, %s971_s26  }
  0x43   : > { %p1180_p10 = scmp.ne.s32.totalorder %s1177_s18, 0 }
  0x44   : > { %s180_s11 = sand.u32 (!%p1180_p10), 1, %s958_s13   ;;  %p1181_p1 = scmp.ne.s32.totalorder (!%p1180_p10), %s1176_s17, 0 }
  0x45   : > { %178 = sbr.rel (%p1180_p10) target bundleno = 634 (0x27a), region = 32  ;;  %s667_s12 = sshll.u32 (!%p1180_p10), %s180_s11, 6 }
  0x46   : > { %s181_s19 = scalar_lea.sflag (!%p1180_p10), [#allocation3], %s180_s11  ;;  %s184_s21 = scalar_lea.vmem (!%p1180_p10), [#allocation2], %s667_s12 }
  0x4a   : > { %945 = dma.done.wait (%p1181_p1), %s181_s19, 1024  }
  0x4b   : > { %947 = vsyncadd (%p1181_p1), %s181_s19, 4294966272  ;;  %p1182_p4 = scmp.eq.s32.totalorder %s1014_s16, 0 }
  0x4d   : > { %949 = dma.done.wait (%p1182_p4), [#allocation5], 1536   ;;  %p1183_p5 = pmov %p1182_p4 }
  0x4e   : > { %vm230_vm0 = vcmask 130048   ;;  %v229_v0 = vld [vmem:[#allocation4 + $0x8] sm:$0xff]  ;;  %v228_v1 = vld [vmem:[#allocation4] sm:$0xff]  ;;  %v222_v4 = vld [vmem:[%s184_s21 + $0x10] sm:$0xff]  ;;  %vm370_vm1 = vcmask 523264   ;;  %s973_s17 = smov 8  }
  0x4f   : > { %951 = vsyncadd (%p1183_p5), [#allocation5], 4294965760  ;;  %v220_v2 = vld [vmem:[%s184_s21] sm:$0xff]  ;;  %720 = vmatprep.subr.mxu0 %v229_v0  ;;  %v221_v3 = vld [vmem:[%s184_s21 + $0x8] sm:$0xff]  ;;  %s974_s18 = smov 120   ;;  %p215_p7 = scmp.lt.s32.totalorder %s1014_s16, 7 }
  0x50   : > { %724 = vmatprep.mubr.msk.f32.mxu0 %vm230_vm0, %v220_v2  ;;  %721 = vmatpush3.msra.mxu0 %v229_v0  ;;  %v223_v5 = vld [vmem:[%s184_s21 + $0x18] sm:$0xff]  ;;  %v224_v6 = vld [vmem:[%s184_s21 + $0x20] sm:$0xff]  ;;  %v225_v7 = vld [vmem:[%s184_s21 + $0x28] sm:$0xff]  ;;  %vm561_vm2 = vcmask 64512  }
  0x51   : > { %722 = vmatprep.subr.mxu0 %v228_v1  ;;  %v226_v8 = vld [vmem:[%s184_s21 + $0x30] sm:$0xff]  ;;  %v227_v9 = vld [vmem:[%s184_s21 + $0x38] sm:$0xff]  ;;  %v366_v22 = vld [vmem:[#allocation6 + $0x30] sm:$0xff]  ;;  %s1189_s16 = smov (!%p215_p7, %s1014_s16), 7 }
  0x52   : > { %723 = vmatpush3.msra.mxu0 %v228_v1  ;;  %v364_v10 = vld [vmem:[#allocation6 + $0x20] sm:$0xff]  ;;  %v365_v20 = vld [vmem:[#allocation6 + $0x28] sm:$0xff]  ;;  %v362_v23 = vld [vmem:[#allocation6 + $0x10] sm:$0xff]  ;;  %s783_s25 = smul.u32 40, %s1189_s16 }
  0x53   : > { %725 = vmatmul.mubr.msk.f32.vlgmr.msra.gmra.mxu0 %vm230_vm0, %v221_v3  ;;  %758 = vmatprep.mubr.msk.f32.mxu1 %vm370_vm1, %v364_v10  ;;  %v360_v11 = vld [vmem:[#allocation6] sm:$0xff]  ;;  %v361_v21 = vld [vmem:[#allocation6 + $0x8] sm:$0xff]  ;;  %v367_v24 = vld [vmem:[#allocation6 + $0x38] sm:$0xff] }
  0x54   : > { %727 = vmatprep.mubr.msk.f32.mxu0 %vm230_vm0, %v222_v4  ;;  %v363_v25 = vld [vmem:[#allocation6 + $0x18] sm:$0xff]  ;;  %v368_v26 = vld [vmem:[#allocation6 + $0x40] sm:$0xff]  ;;  %v369_v27 = vld [vmem:[#allocation6 + $0x48] sm:$0xff]  ;;  %s219_s22 = scalar_lea.vmem %s1172_s3, %s783_s25 }
  0x57   : > { %728 = vmatmul.mubr.msk.f32.gmra.mxu0 %vm230_vm0, %v223_v5 }
  0x58   : > { %730 = vmatprep.mubr.msk.f32.mxu0 %vm230_vm0, %v224_v6 }
  0x5b   : > { %731 = vmatmul.mubr.msk.f32.gmra.mxu0 %vm230_vm0, %v225_v7 }
  0x5c   : > { %733 = vmatprep.mubr.msk.f32.mxu0 %vm230_vm0, %v226_v8 }
  0x5f   : > { %734 = vmatmul.mubr.msk.f32.gmra.mxu0 %vm230_vm0, %v227_v9 }
  0x60   : > { %752 = vmatprep.mubr.msk.f32.mxu0 %vm370_vm1, %v360_v11 }
 0x113   : > { %v726_v12 = vpop.f32.mrf.mxu0 }
 0x115   : > { %v321_v13 = vpop.f32.mrf.mxu0 }
 0x117   : > { %v729_v14 = vpop.f32.mrf.mxu0 }
 0x119   : > { %v331_v15 = vpop.f32.mrf.mxu0 }
 0x11b   : > { %v732_v16 = vpop.f32.mrf.mxu0 }
 0x11d   : > { %v341_v17 = vpop.f32.mrf.mxu0 }
 0x11f   : > { %v735_v18 = vpop.f32.mrf.mxu0 }
 0x120   : > { %736 = vmatprep.subr.mxu0 %v735_v18  ;;  %767 = vmatprep.subr.mxu1 %v735_v18 }
 0x121   : > { %v351_v19 = vpop.f32.mrf.mxu0  ;;  %737 = vmatpush3.msra.mxu0 %v735_v18  ;;  %775 = vmatpush3.msra.mxu1 %v735_v18 }
 0x122   : > { %738 = vmatprep.subr.mxu0 %v351_v19  ;;  %768 = vmatprep.subr.mxu1 %v351_v19 }
 0x123   : > { %739 = vmatpush3.msra.mxu0 %v351_v19  ;;  %776 = vmatpush3.msra.mxu1 %v351_v19 }
 0x124   : > { %740 = vmatprep.subr.mxu0 %v732_v16  ;;  %769 = vmatprep.subr.mxu1 %v732_v16 }
 0x125   : > { %741 = vmatpush3.msra.mxu0 %v732_v16  ;;  %777 = vmatpush3.msra.mxu1 %v732_v16 }
 0x126   : > { %742 = vmatprep.subr.mxu0 %v341_v17  ;;  %770 = vmatprep.subr.mxu1 %v341_v17 }
 0x127   : > { %743 = vmatpush3.msra.mxu0 %v341_v17  ;;  %778 = vmatpush3.msra.mxu1 %v341_v17 }
 0x128   : > { %744 = vmatprep.subr.mxu0 %v729_v14  ;;  %771 = vmatprep.subr.mxu1 %v729_v14 }
 0x129   : > { %745 = vmatpush3.msra.mxu0 %v729_v14  ;;  %779 = vmatpush3.msra.mxu1 %v729_v14 }
 0x12a   : > { %746 = vmatprep.subr.mxu0 %v331_v15  ;;  %772 = vmatprep.subr.mxu1 %v331_v15 }
 0x12b   : > { %747 = vmatpush3.msra.mxu0 %v331_v15  ;;  %780 = vmatpush3.msra.mxu1 %v331_v15 }
 0x12c   : > { %748 = vmatprep.subr.mxu0 %v726_v12  ;;  %773 = vmatprep.subr.mxu1 %v726_v12 }
 0x12d   : > { %749 = vmatpush3.msra.mxu0 %v726_v12  ;;  %781 = vmatpush3.msra.mxu1 %v726_v12 }
 0x12e   : > { %750 = vmatprep.subr.mxu0 %v321_v13  ;;  %774 = vmatprep.subr.mxu1 %v321_v13 }
 0x12f   : > { %751 = vmatpush3.msra.mxu0 %v321_v13  ;;  %782 = vmatpush3.msra.mxu1 %v321_v13 }
 0x130   : > { %759 = vmatmul.mubr.msk.f32.vlgmr.msra.gmra.mxu1 %vm370_vm1, %v365_v20  ;;  %753 = vmatmul.mubr.msk.f32.vlgmr.msra.gmra.mxu0 %vm370_vm1, %v361_v21 }
 0x131   : > { %761 = vmatprep.mubr.msk.f32.mxu1 %vm370_vm1, %v366_v22  ;;  %755 = vmatprep.mubr.msk.f32.mxu0 %vm370_vm1, %v362_v23 }
 0x134   : > { %762 = vmatmul.mubr.msk.f32.gmra.mxu1 %vm370_vm1, %v367_v24  ;;  %756 = vmatmul.mubr.msk.f32.gmra.mxu0 %vm370_vm1, %v363_v25 }
 0x135   : > { %764 = vmatprep.mubr.msk.f32.mxu1 %vm370_vm1, %v368_v26 }
 0x138   : > { %765 = vmatmul.mubr.msk.f32.gmra.mxu1 %vm370_vm1, %v369_v27 }
 0x1f0   : > { %v760_v28 = vpop.f32.mrf.mxu1  ;;  %v754_v34 = vpop.f32.mrf.mxu0 }
 0x1f1   : > { %541 = vrot.lane.b32.xlu1 %v760_v28, %s973_s17  ;;  %521 = vrot.lane.b32.xlu0 %v760_v28, %s974_s18 }
 0x1f2   : > { %v487_v29 = vpop.f32.mrf.mxu1  ;;  %v467_v35 = vpop.f32.mrf.mxu0 }
 0x1f4   : > { %v763_v30 = vpop.f32.mrf.mxu1  ;;  %v757_v40 = vpop.f32.mrf.mxu0 }
 0x1f5   : > { %525 = vrot.lane.b32.xlu1 %v763_v30, %s974_s18 }
 0x1f6   : > { %v497_v31 = vpop.f32.mrf.mxu1  ;;  %v477_v43 = vpop.f32.mrf.mxu0 }
 0x1f7   : > { %523 = vrot.lane.b32.xlu0 %v497_v31, %s974_s18 }
 0x1f8   : > { %v766_v32 = vpop.f32.mrf.mxu1 }
 0x1f9   : > { %545 = vrot.lane.b32.xlu1 %v763_v30, %s973_s17 }
 0x1fa   : > { %v507_v33 = vpop.f32.mrf.mxu1 }
 0x1fb   : > { %543 = vrot.lane.b32.xlu0 %v497_v31, %s973_s17 }
 0x1fd   : > { %527 = vrot.lane.b32.xlu1 %v507_v33, %s974_s18 }
 0x1ff   : > { %529 = vrot.lane.b32.xlu0 %v766_v32, %s974_s18 }
 0x201   : > { %549 = vrot.lane.b32.xlu1 %v766_v32, %s973_s17 }
 0x203   : > { %547 = vrot.lane.b32.xlu0 %v507_v33, %s973_s17 }
 0x263   : > { %v542_v36 = vpop.permute.xlu1 %541  ;;  %v522_v37 = vpop.permute.xlu0 %521 }
 0x264   : > { %v536_v38 = vsub.f32 %v467_v35, %v522_v37  ;;  %v556_v39 = vadd.f32 %v542_v36, %v467_v35 }
 0x266   : > { %v562_v41 = vsel %vm561_vm2, %v536_v38, %v556_v39 }
 0x267   : > { %567 = vst.msk [vmem:[%s219_s22] sm:$0xff] %vm230_vm0, %v562_v41  ;;  %v526_v42 = vpop.permute.xlu1 %525 }
 0x268   : > { %v538_v46 = vsub.f32 %v477_v43, %v526_v42 }
 0x269   : > { %v524_v44 = vpop.permute.xlu0 %523 }
 0x26a   : > { %v537_v49 = vsub.f32 %v754_v34, %v524_v44 }
 0x26b   : > { %v546_v45 = vpop.permute.xlu1 %545 }
 0x26c   : > { %v558_v47 = vadd.f32 %v546_v45, %v477_v43 }
 0x26d   : > { %v544_v48 = vpop.permute.xlu0 %543 }
 0x26e   : > { %v564_v50 = vsel %vm561_vm2, %v538_v46, %v558_v47  ;;  %v557_v51 = vadd.f32 %v754_v34, %v544_v48 }
 0x26f   : > { %569 = vst.msk [vmem:[%s219_s22 + $0x10] sm:$0xff] %vm230_vm0, %v564_v50  ;;  %v528_v52 = vpop.permute.xlu1 %527 }
 0x270   : > { %v563_v53 = vsel %vm561_vm2, %v537_v49, %v557_v51  ;;  %v539_v59 = vsub.f32 %v757_v40, %v528_v52 }
 0x271   : > { %568 = vst.msk [vmem:[%s219_s22 + $0x8] sm:$0xff] %vm230_vm0, %v563_v53  ;;  %v530_v54 = vpop.permute.xlu0 %529 }
 0x272   : > { %v540_v56 = vsub.f32 %v487_v29, %v530_v54 }
 0x273   : > { %v550_v55 = vpop.permute.xlu1 %549 }
 0x274   : > { %v560_v57 = vadd.f32 %v550_v55, %v487_v29 }
 0x275   : > { %v548_v58 = vpop.permute.xlu0 %547 }
 0x276   : > { %v566_v60 = vsel %vm561_vm2, %v540_v56, %v560_v57  ;;  %v559_v61 = vadd.f32 %v757_v40, %v548_v58 }
 0x277   : > { %571 = vst.msk [vmem:[%s219_s22 + $0x20] sm:$0xff] %vm230_vm0, %v566_v60 }
 0x278   : > { %v565_v62 = vsel %vm561_vm2, %v539_v59, %v559_v61 }
 0x279   : > { %570 = vst.msk [vmem:[%s219_s22 + $0x18] sm:$0xff] %vm230_vm0, %v565_v62 }
 0x27a PF: > { %p14_p12 = scmp.ge.s32.totalorder %s1063_s5, 10   ;;  %s1184_s12 = smov %s958_s13 }
 0x27b   : > { %s1185_s13 = smov %s962_s14  ;;  %s1186_s14 = smov %s1074_s9 }
 0x27c   : > { %s1187_s15 = smov %s1063_s5  ;;  %16 = sbr.rel (!%p14_p12) target bundleno = 4 (0x4), region = 80 }
 0x281   :  { %593 = vsyncpa [#allocation3], 1 }
 0x282   :  { %595 = vsyncpa [#allocation3 + $0x1], 1 }
 0x283   :  { %596 = vsyncpa [#allocation5], 1 }

</bundles_post_ra>
